<compile_context>
chip_gen: v5e
topology: v5e:2x2
jax: 0.10.0
libtpu: 0.0.40
codegen_flags: <defaults>
</compile_context>

<pallas_src>
import functools

import jax
import jax.numpy as jnp
from jax.experimental import pallas as pl
from jax.experimental.pallas import tpu as pltpu


_SUBLANE = 16   # bf16 sublane packing: batch tiles must be multiples of 16
_LANE = 128


def _round_up(x: int, m: int) -> int:
    return pl.cdiv(x, m) * m


def actor_critic_kernel(
    n_actions,              # static (closed over via functools.partial)
    x_ref,                  # (bt, input_size)   bf16
    w1_ref, b1_ref,         # (input_size, H)    bf16 / (1, H) f32
    w2_ref, b2_ref,         # (H, H)             bf16 / (1, H) f32
    w3_ref, b3_ref,         # (H, H)             bf16 / (1, H) f32
    wh_ref, bh_ref,         # fused heads [wm|wv|wval], zero-padded to 128 lanes
    out_ref,                # (bt, out_pad)      f32, lane-dense fused output
):
    x = x_ref[...]

    # base1 / base2 / base3: Linear + ReLU. bf16 operands, f32 accumulation.
    h = jnp.dot(x, w1_ref[...], preferred_element_type=jnp.float32) + b1_ref[...]
    h = jnp.maximum(h, 0.0).astype(jnp.bfloat16)
    h = jnp.dot(h, w2_ref[...], preferred_element_type=jnp.float32) + b2_ref[...]
    h = jnp.maximum(h, 0.0).astype(jnp.bfloat16)
    h = jnp.dot(h, w3_ref[...], preferred_element_type=jnp.float32) + b3_ref[...]
    h = jnp.maximum(h, 0.0).astype(jnp.bfloat16)

    # fused heads: single matmul over the concatenated (padded) head weights
    z = jnp.dot(h, wh_ref[...], preferred_element_type=jnp.float32) + bh_ref[...]

    # per-column activation, kept lane-dense via iota + select:
    #   cols [0, A)    -> tanh      (mean head)
    #   cols [A, 2A)   -> softplus  (var head)
    #   cols [2A, ...) -> identity  (value head + zero padding)
    # (out_pad is a single 128-lane block at these sizes, so the EUP work on
    #  padded lanes is one vreg and free under MXU slack.)
    col = jax.lax.broadcasted_iota(jnp.int32, z.shape, dimension=1)
    tanh_z = jnp.tanh(z)
    softplus_z = jnp.maximum(z, 0.0) + jnp.log1p(jnp.exp(-jnp.abs(z)))  # stable, matches torch
    out = jnp.where(col < n_actions, tanh_z,
                    jnp.where(col < 2 * n_actions, softplus_z, z))

    out_ref[...] = out.astype(out_ref.dtype)


def pack_params(params, input_size, n_actions, hidden_units, dtype=jnp.bfloat16):
    """One-time packing: fuse head weights, cast to bf16, pad lane dims to 128.

    The input width (w1's first dim) is intentionally left UNPADDED so x can
    stay narrow in HBM; Mosaic pads lanes/sublanes in VMEM for free.
    """
    h_pad = _round_up(hidden_units, _LANE)
    out_pad = _round_up(2 * n_actions + 1, _LANE)

    def pad2(a, rows, cols):
        return jnp.pad(a, ((0, rows - a.shape[0]), (0, cols - a.shape[1])))

    w_heads = jnp.concatenate([params["wm"], params["wv"], params["wval"]], axis=1)
    b_heads = jnp.concatenate([params["bm"], params["bv"], params["bval"]], axis=1)

    return dict(
        w1=pad2(params["w1"], input_size, h_pad).astype(dtype),
        b1=pad2(params["b1"], 1, h_pad).astype(jnp.float32),
        w2=pad2(params["w2"], h_pad, h_pad).astype(dtype),
        b2=pad2(params["b2"], 1, h_pad).astype(jnp.float32),
        w3=pad2(params["w3"], h_pad, h_pad).astype(dtype),
        b3=pad2(params["b3"], 1, h_pad).astype(jnp.float32),
        wh=pad2(w_heads, h_pad, out_pad).astype(dtype),
        bh=pad2(b_heads, 1, out_pad).astype(jnp.float32),
    )


def _choose_batch_tile(B, desired, sublane=_SUBLANE):
    """Pick a batch tile: big (MXU M-dim + amortized grid overhead), but keep
    >=2 grid steps when the batch allows so the second TensorCore (v7x) is used."""
    desired = _round_up(max(desired, sublane), sublane)
    b_round = _round_up(B, sublane)
    if b_round <= desired:
        return b_round                                   # tiny batch: one tile
    if b_round < 2 * desired:
        return _round_up(pl.cdiv(b_round, 2), sublane)   # split so grid >= 2
    return desired


def actor_critic_forward(x, packed, n_actions, *, batch_tile=256):
    """x: (B, input_size) f32. packed: output of pack_params. Returns (mean, var, value)."""
    B, in_size = x.shape
    assert packed["w1"].shape[0] == in_size
    h_pad = packed["w1"].shape[1]
    out_pad = packed["wh"].shape[1]

    tile = _choose_batch_tile(B, batch_tile)
    assert tile % _SUBLANE == 0, "batch tile must be a multiple of the bf16 sublane tile (16)"
    b_pad = _round_up(max(B, tile), tile)

    # x kept at its real width in HBM (no 128-lane padding of the input dim).
    x_p = jnp.zeros((b_pad, in_size), jnp.bfloat16).at[:B, :].set(x.astype(jnp.bfloat16))

    grid = (b_pad // tile,)

    kernel = functools.partial(actor_critic_kernel, n_actions)

    out = pl.pallas_call(
        kernel,
        out_shape=jax.ShapeDtypeStruct((b_pad, out_pad), jnp.float32),
        grid=grid,
        in_specs=[
            # activations: tiled over the batch grid axis; full (unpadded) last dim
            pl.BlockSpec((tile, in_size), lambda i: (i, 0)),
            # weights / biases: constant block index -> VMEM-resident across grid steps.
            # (When scaling hidden_units, add pipeline_mode=pl.Buffered(1) here and
            #  tile the hidden dim with an "arbitrary" K grid axis for v7x's 64 MiB VMEM.)
            pl.BlockSpec((in_size, h_pad), lambda i: (0, 0)),
            pl.BlockSpec((1, h_pad), lambda i: (0, 0)),
            pl.BlockSpec((h_pad, h_pad), lambda i: (0, 0)),
            pl.BlockSpec((1, h_pad), lambda i: (0, 0)),
            pl.BlockSpec((h_pad, h_pad), lambda i: (0, 0)),
            pl.BlockSpec((1, h_pad), lambda i: (0, 0)),
            pl.BlockSpec((h_pad, out_pad), lambda i: (0, 0)),
            pl.BlockSpec((1, out_pad), lambda i: (0, 0)),
        ],
        out_specs=pl.BlockSpec((tile, out_pad), lambda i: (i, 0)),
        compiler_params=pltpu.CompilerParams(
            dimension_semantics=("parallel",),      # shard batch tiles across TCs (v7x)
            vmem_limit_bytes=48 * 1024 * 1024,      # above 16/32 MiB defaults, below v7x's 64 MiB
        ),
    )(
        x_p,
        packed["w1"], packed["b1"],
        packed["w2"], packed["b2"],
        packed["w3"], packed["b3"],
        packed["wh"], packed["bh"],
    )

    mean = out[:B, :n_actions]
    var = out[:B, n_actions:2 * n_actions]
    value = out[:B, 2 * n_actions:2 * n_actions + 1]
    return mean, var, value


def init_params(key, input_size, n_actions, hidden_units):
    """Deterministic synthetic parameter init (shapes match nn.Linear, transposed)."""
    ks = jax.random.split(key, 12)

    def lin(kw, kb, fan_in, fan_out):
        bound = 1.0 / jnp.sqrt(fan_in)
        w = jax.random.uniform(kw, (fan_in, fan_out), jnp.float32, -bound, bound)
        b = jax.random.uniform(kb, (1, fan_out), jnp.float32, -bound, bound)
        return w, b

    w1, b1 = lin(ks[0], ks[1], input_size, hidden_units)
    w2, b2 = lin(ks[2], ks[3], hidden_units, hidden_units)
    w3, b3 = lin(ks[4], ks[5], hidden_units, hidden_units)
    wm, bm = lin(ks[6], ks[7], hidden_units, n_actions)
    wv, bv = lin(ks[8], ks[9], hidden_units, n_actions)
    wval, bval = lin(ks[10], ks[11], hidden_units, 1)

    return dict(w1=w1, b1=b1, w2=w2, b2=b2, w3=w3, b3=b3,
                wm=wm, bm=bm, wv=wv, bv=bv, wval=wval, bval=bval)


def reference_forward(x, p):
    """Pure-JAX f32 reference (mirrors the PyTorch module)."""
    h = jax.nn.relu(x @ p["w1"] + p["b1"])
    h = jax.nn.relu(h @ p["w2"] + p["b2"])
    h = jax.nn.relu(h @ p["w3"] + p["b3"])
    mean = jnp.tanh(h @ p["wm"] + p["bm"])
    var = jax.nn.softplus(h @ p["wv"] + p["bv"])
    value = h @ p["wval"] + p["bval"]
    return mean, var, value


def _check(x, params, packed, n_actions, tol):
    mean, var, value = actor_critic_forward(x, packed, n_actions)
    jax.block_until_ready((mean, var, value))
    m_ref, v_ref, val_ref = reference_forward(x, params)
    B = x.shape[0]
    assert mean.shape == (B, n_actions)
    assert var.shape == (B, n_actions)
    assert value.shape == (B, 1)
    # bf16 operands (f32 accumulation) -> loosened tolerance vs the f32 reference.
    assert jnp.allclose(mean, m_ref, atol=tol, rtol=tol)
    assert jnp.allclose(var, v_ref, atol=tol, rtol=tol)
    assert jnp.allclose(value, val_ref, atol=tol, rtol=tol)


if __name__ == "__main__":
    key = jax.random.PRNGKey(0)
    k_param, k_x, k_x2 = jax.random.split(key, 3)

    batch = 2
    input_size = 8
    n_actions = 4
    hidden_units = 32

    params = init_params(k_param, input_size, n_actions, hidden_units)
    packed = pack_params(params, input_size, n_actions, hidden_units)

    # small-batch smoke test (single grid step)
    x_small = jax.random.normal(k_x, (batch, input_size), jnp.float32)
    _check(x_small, params, packed, n_actions, tol=5e-2)

    # larger batch exercises the 256-row tiles and a >=2-step parallel grid
    x_large = jax.random.normal(k_x2, (512, input_size), jnp.float32)
    _check(x_large, params, packed, n_actions, tol=5e-2)

    print("KERNEL_OK")
</pallas_src>

<mosaic_0001>
module attributes {stable_mosaic.version = 11 : i64} {
  func.func @actor_critic_kernel(%arg0: i32, %arg1: memref<16x8xbf16, #tpu.memory_space<vmem>>, %arg2: memref<8x128xbf16, #tpu.memory_space<vmem>>, %arg3: memref<1x128xf32, #tpu.memory_space<vmem>>, %arg4: memref<128x128xbf16, #tpu.memory_space<vmem>>, %arg5: memref<1x128xf32, #tpu.memory_space<vmem>>, %arg6: memref<128x128xbf16, #tpu.memory_space<vmem>>, %arg7: memref<1x128xf32, #tpu.memory_space<vmem>>, %arg8: memref<128x128xbf16, #tpu.memory_space<vmem>>, %arg9: memref<1x128xf32, #tpu.memory_space<vmem>>, %arg10: memref<16x128xf32, #tpu.memory_space<vmem>>) attributes {dimension_semantics = [#tpu.dimension_semantics<parallel>], iteration_bounds = array<i64: 1>, scalar_prefetch = 0 : i64, scratch_operands = 0 : i64, tpu.core_type = #tpu.core_type<tc>, window_params = [{transform_indices = @transform_0, window_bounds = array<i64: 16, 8>}, {pipeline_mode = #tpu.pipeline_mode<synchronous>, transform_indices = @transform_1, window_bounds = array<i64: 8, 128>}, {pipeline_mode = #tpu.pipeline_mode<synchronous>, transform_indices = @transform_2, window_bounds = array<i64: 1, 128>}, {pipeline_mode = #tpu.pipeline_mode<synchronous>, transform_indices = @transform_3, window_bounds = array<i64: 128, 128>}, {pipeline_mode = #tpu.pipeline_mode<synchronous>, transform_indices = @transform_4, window_bounds = array<i64: 1, 128>}, {pipeline_mode = #tpu.pipeline_mode<synchronous>, transform_indices = @transform_5, window_bounds = array<i64: 128, 128>}, {pipeline_mode = #tpu.pipeline_mode<synchronous>, transform_indices = @transform_6, window_bounds = array<i64: 1, 128>}, {pipeline_mode = #tpu.pipeline_mode<synchronous>, transform_indices = @transform_7, window_bounds = array<i64: 128, 128>}, {pipeline_mode = #tpu.pipeline_mode<synchronous>, transform_indices = @transform_8, window_bounds = array<i64: 1, 128>}, {transform_indices = @transform_9, window_bounds = array<i64: 16, 128>}]} {
    %c0 = arith.constant 0 : index
    %c0_0 = arith.constant 0 : index
    %0 = vector.load %arg1[%c0, %c0_0] : memref<16x8xbf16, #tpu.memory_space<vmem>>, vector<16x8xbf16>
    %c0_1 = arith.constant 0 : index
    %c0_2 = arith.constant 0 : index
    %1 = vector.load %arg2[%c0_1, %c0_2] : memref<8x128xbf16, #tpu.memory_space<vmem>>, vector<8x128xbf16>
    %cst = arith.constant dense<0.000000e+00> : vector<16x128xf32>
    %2 = tpu.matmul %0, %1, %cst {dimension_numbers = #tpu.dot_dimension_numbers<[1], [0], [0], [1], [0, 0, 1, 1], [], []>} : vector<16x8xbf16>, vector<8x128xbf16>, vector<16x128xf32> -> vector<16x128xf32>
    %c0_3 = arith.constant 0 : index
    %c0_4 = arith.constant 0 : index
    %3 = vector.load %arg3[%c0_3, %c0_4] : memref<1x128xf32, #tpu.memory_space<vmem>>, vector<1x128xf32>
    %4 = vector.broadcast %3 : vector<1x128xf32> to vector<16x128xf32>
    %5 = arith.addf %2, %4 : vector<16x128xf32>
    %cst_5 = arith.constant 0.000000e+00 : f32
    %6 = vector.broadcast %cst_5 : f32 to vector<16x128xf32>
    %7 = arith.maximumf %5, %6 : vector<16x128xf32>
    %8 = arith.truncf %7 : vector<16x128xf32> to vector<16x128xbf16>
    %c0_6 = arith.constant 0 : index
    %c0_7 = arith.constant 0 : index
    %9 = vector.load %arg4[%c0_6, %c0_7] : memref<128x128xbf16, #tpu.memory_space<vmem>>, vector<128x128xbf16>
    %cst_8 = arith.constant dense<0.000000e+00> : vector<16x128xf32>
    %10 = tpu.matmul %8, %9, %cst_8 {dimension_numbers = #tpu.dot_dimension_numbers<[1], [0], [0], [1], [0, 0, 1, 1], [], []>} : vector<16x128xbf16>, vector<128x128xbf16>, vector<16x128xf32> -> vector<16x128xf32>
    %c0_9 = arith.constant 0 : index
    %c0_10 = arith.constant 0 : index
    %11 = vector.load %arg5[%c0_9, %c0_10] : memref<1x128xf32, #tpu.memory_space<vmem>>, vector<1x128xf32>
    %12 = vector.broadcast %11 : vector<1x128xf32> to vector<16x128xf32>
    %13 = arith.addf %10, %12 : vector<16x128xf32>
    %cst_11 = arith.constant 0.000000e+00 : f32
    %14 = vector.broadcast %cst_11 : f32 to vector<16x128xf32>
    %15 = arith.maximumf %13, %14 : vector<16x128xf32>
    %16 = arith.truncf %15 : vector<16x128xf32> to vector<16x128xbf16>
    %c0_12 = arith.constant 0 : index
    %c0_13 = arith.constant 0 : index
    %17 = vector.load %arg6[%c0_12, %c0_13] : memref<128x128xbf16, #tpu.memory_space<vmem>>, vector<128x128xbf16>
    %cst_14 = arith.constant dense<0.000000e+00> : vector<16x128xf32>
    %18 = tpu.matmul %16, %17, %cst_14 {dimension_numbers = #tpu.dot_dimension_numbers<[1], [0], [0], [1], [0, 0, 1, 1], [], []>} : vector<16x128xbf16>, vector<128x128xbf16>, vector<16x128xf32> -> vector<16x128xf32>
    %c0_15 = arith.constant 0 : index
    %c0_16 = arith.constant 0 : index
    %19 = vector.load %arg7[%c0_15, %c0_16] : memref<1x128xf32, #tpu.memory_space<vmem>>, vector<1x128xf32>
    %20 = vector.broadcast %19 : vector<1x128xf32> to vector<16x128xf32>
    %21 = arith.addf %18, %20 : vector<16x128xf32>
    %cst_17 = arith.constant 0.000000e+00 : f32
    %22 = vector.broadcast %cst_17 : f32 to vector<16x128xf32>
    %23 = arith.maximumf %21, %22 : vector<16x128xf32>
    %24 = arith.truncf %23 : vector<16x128xf32> to vector<16x128xbf16>
    %c0_18 = arith.constant 0 : index
    %c0_19 = arith.constant 0 : index
    %25 = vector.load %arg8[%c0_18, %c0_19] : memref<128x128xbf16, #tpu.memory_space<vmem>>, vector<128x128xbf16>
    %cst_20 = arith.constant dense<0.000000e+00> : vector<16x128xf32>
    %26 = tpu.matmul %24, %25, %cst_20 {dimension_numbers = #tpu.dot_dimension_numbers<[1], [0], [0], [1], [0, 0, 1, 1], [], []>} : vector<16x128xbf16>, vector<128x128xbf16>, vector<16x128xf32> -> vector<16x128xf32>
    %c0_21 = arith.constant 0 : index
    %c0_22 = arith.constant 0 : index
    %27 = vector.load %arg9[%c0_21, %c0_22] : memref<1x128xf32, #tpu.memory_space<vmem>>, vector<1x128xf32>
    %28 = vector.broadcast %27 : vector<1x128xf32> to vector<16x128xf32>
    %29 = arith.addf %26, %28 : vector<16x128xf32>
    %30 = tpu.iota {dimensions = array<i32: 1>} : vector<16x128xi32>
    %31 = math.tanh %29 : vector<16x128xf32>
    %cst_23 = arith.constant 0.000000e+00 : f32
    %32 = vector.broadcast %cst_23 : f32 to vector<16x128xf32>
    %33 = arith.maximumf %29, %32 : vector<16x128xf32>
    %34 = math.absf %29 : vector<16x128xf32>
    %cst_24 = arith.constant 0.000000e+00 : f32
    %35 = vector.broadcast %cst_24 : f32 to vector<16x128xf32>
    %36 = arith.subf %35, %34 : vector<16x128xf32>
    %37 = math.exp %36 : vector<16x128xf32>
    %38 = math.log1p %37 : vector<16x128xf32>
    %39 = arith.addf %33, %38 : vector<16x128xf32>
    %c4_i32 = arith.constant 4 : i32
    %40 = vector.broadcast %c4_i32 : i32 to vector<16x128xi32>
    %41 = arith.cmpi slt, %30, %40 : vector<16x128xi32>
    %c8_i32 = arith.constant 8 : i32
    %42 = vector.broadcast %c8_i32 : i32 to vector<16x128xi32>
    %43 = arith.cmpi slt, %30, %42 : vector<16x128xi32>
    %44 = arith.select %43, %39, %29 : vector<16x128xi1>, vector<16x128xf32>
    %45 = arith.select %41, %31, %44 : vector<16x128xi1>, vector<16x128xf32>
    %c0_25 = arith.constant 0 : index
    %c0_26 = arith.constant 0 : index
    %46 = vector.load %arg10[%c0_25, %c0_26] : memref<16x128xf32, #tpu.memory_space<vmem>>, vector<16x128xf32>
    tpu.vector_store %arg10[%c0_25, %c0_26], %45 {strides = array<i32>} : memref<16x128xf32, #tpu.memory_space<vmem>>, vector<16x128xf32>,
    return
  }
  func.func @transform_0(%arg0: i32) -> (i32, i32) {
    %c0_i32 = arith.constant 0 : i32
    %c0_i32_0 = arith.constant 0 : i32
    return %arg0, %c0_i32 : i32, i32
  }
  func.func @transform_1(%arg0: i32) -> (i32, i32) {
    %c0_i32 = arith.constant 0 : i32
    %c0_i32_0 = arith.constant 0 : i32
    %c0_i32_1 = arith.constant 0 : i32
    return %c0_i32, %c0_i32_0 : i32, i32
  }
  func.func @transform_2(%arg0: i32) -> (i32, i32) {
    %c0_i32 = arith.constant 0 : i32
    %c0_i32_0 = arith.constant 0 : i32
    %c0_i32_1 = arith.constant 0 : i32
    return %c0_i32, %c0_i32_0 : i32, i32
  }
  func.func @transform_3(%arg0: i32) -> (i32, i32) {
    %c0_i32 = arith.constant 0 : i32
    %c0_i32_0 = arith.constant 0 : i32
    %c0_i32_1 = arith.constant 0 : i32
    return %c0_i32, %c0_i32_0 : i32, i32
  }
  func.func @transform_4(%arg0: i32) -> (i32, i32) {
    %c0_i32 = arith.constant 0 : i32
    %c0_i32_0 = arith.constant 0 : i32
    %c0_i32_1 = arith.constant 0 : i32
    return %c0_i32, %c0_i32_0 : i32, i32
  }
  func.func @transform_5(%arg0: i32) -> (i32, i32) {
    %c0_i32 = arith.constant 0 : i32
    %c0_i32_0 = arith.constant 0 : i32
    %c0_i32_1 = arith.constant 0 : i32
    return %c0_i32, %c0_i32_0 : i32, i32
  }
  func.func @transform_6(%arg0: i32) -> (i32, i32) {
    %c0_i32 = arith.constant 0 : i32
    %c0_i32_0 = arith.constant 0 : i32
    %c0_i32_1 = arith.constant 0 : i32
    return %c0_i32, %c0_i32_0 : i32, i32
  }
  func.func @transform_7(%arg0: i32) -> (i32, i32) {
    %c0_i32 = arith.constant 0 : i32
    %c0_i32_0 = arith.constant 0 : i32
    %c0_i32_1 = arith.constant 0 : i32
    return %c0_i32, %c0_i32_0 : i32, i32
  }
  func.func @transform_8(%arg0: i32) -> (i32, i32) {
    %c0_i32 = arith.constant 0 : i32
    %c0_i32_0 = arith.constant 0 : i32
    %c0_i32_1 = arith.constant 0 : i32
    return %c0_i32, %c0_i32_0 : i32, i32
  }
  func.func @transform_9(%arg0: i32) -> (i32, i32) {
    %c0_i32 = arith.constant 0 : i32
    %c0_i32_0 = arith.constant 0 : i32
    return %arg0, %c0_i32 : i32, i32
  }
}

</mosaic_0001>

<bundles_post_ra>
// kernel: tpu_custom_call.1
= control target key start
LH: loop header
LB: loop body
LE: loop exit
PB: predicated region body
PF: predicated region fallthrough
CT: control target
= control target key end

     0   :  { %14 = vsyncpa [#allocation3], 0  ;;  %s776_s0 = inlined_call_operand.vmem [shape: bf16[16,8], index: 0, kind: input, shape index: {}]   ;;  %s777_s1 = inlined_call_operand.vmem [shape: bf16[8,128], index: 1, kind: input, shape index: {}]   ;;  %s778_s2 = inlined_call_operand.vmem [shape: f32[1,128], index: 2, kind: input, shape index: {}]   ;;  %s779_s3 = inlined_call_operand.hbm [shape: bf16[128,128], index: 3, kind: input, shape index: {}]   ;;  %s780_s4 = inlined_call_operand.vmem [shape: f32[1,128], index: 4, kind: input, shape index: {}]   ;;  %s781_s5 = inlined_call_operand.hbm [shape: bf16[128,128], index: 5, kind: input, shape index: {}]   ;;  %s782_s6 = inlined_call_operand.vmem [shape: f32[1,128], index: 6, kind: input, shape index: {}]   ;;  %s783_s7 = inlined_call_operand.hbm [shape: bf16[128,128], index: 7, kind: input, shape index: {}]   ;;  %s784_s8 = inlined_call_operand.vmem [shape: f32[1,128], index: 8, kind: input, shape index: {}]   ;;  %s785_s9 = inlined_call_operand.hbm [shape: f32[16,128], index: 9, kind: output, shape index: {}]  }
   0x1   :  { %15 = vsyncpa [#allocation6], 0 }
   0x2   :  { %16 = vsyncpa [#allocation4], 0  ;;  %s42_s11 = sshll.u32 %s781_s5, 4  ;;  %s684_s12 = smov [#allocation5]   ;;  %s43_s11 = int_to_ptr.hbm [resolvable:$true] %s42_s11 }
   0x3   :  { %s44_s13 = sshll.u32 %s684_s12, 4  ;;  %s27_s16 = sshll.u32 %s779_s3, 4  ;;  %s45_s13 = int_to_ptr.vmem [resolvable:$true] %s44_s13  ;;  %s28_s16 = int_to_ptr.hbm [resolvable:$true] %s27_s16 }
   0x4   :  { %s685_s17 = smov 64   ;;  %s686_s18 = smov 4  }
   0x5   :  { %50 = dma.hbm_to_vmem [thread:$0]  %s43_s11, 1024, %s45_s13, [#allocation6], %s685_s17, %s685_s17, %s686_s18  }
   0x6   :  { %s687_s19 = smov [#allocation2]   ;;  %s57_s23 = sshll.u32 %s783_s7, 4  ;;  %s58_s23 = int_to_ptr.hbm [resolvable:$true] %s57_s23 }
   0x7   :  { %s29_s20 = sshll.u32 %s687_s19, 4  ;;  %s688_s5 = smov [#allocation7]   ;;  %s30_s20 = int_to_ptr.vmem [resolvable:$true] %s29_s20 }
   0x8   :  { %35 = dma.hbm_to_vmem [thread:$0]  %s28_s16, 1024, %s30_s20, [#allocation3], %s685_s17, %s685_s17, %s686_s18  }
   0x9   :  { %s59_s24 = sshll.u32 %s688_s5, 4  ;;  %s60_s24 = int_to_ptr.vmem [resolvable:$true] %s59_s24 }
   0xa   :  { %65 = dma.hbm_to_vmem [thread:$0]  %s58_s23, 1024, %s60_s24, [#allocation6], %s685_s17, %s685_s17, %s686_s18  }
   0xb   :  { %678 = dma.done.wait [#allocation3], 1024  }
   0xc   :  { %679 = vsyncadd [#allocation3], 4294966272 }
   0xd   :  { %680 = dma.done.wait [#allocation6], 2048  }
   0xe   :  { %681 = vsyncadd [#allocation6], 4294965248  ;;  %vm97_vm0 = vcmask 1043456   ;;  %v83_v0 = vld [vmem:[%s777_s1] sm:$0xf]  ;;  %v541_v1 = vld [vmem:[#allocation2 + $0x38] sm:$0xff] }
   0xf   :  { %v99_v2 = vsel %vm97_vm0, %v83_v0, 0  ;;  %v533_v3 = vld [vmem:[%s776_s0] sm:$0xff]  ;;  %vm93_vm1 = vcmask 64512   ;;  %186 = vmatpush.bf16.msra.mxu1 %v541_v1  ;;  %v540_v4 = vld [vmem:[#allocation2 + $0x30] sm:$0xff]  ;;  %v539_v5 = vld [vmem:[#allocation2 + $0x28] sm:$0xff]  ;;  %v370_v1 = vlaneseq  ;;  %s418_s12 = sshll.u32 %s785_s9, 4  ;;  %s419_s12 = int_to_ptr.hbm [resolvable:$true] %s418_s12 }
  0x10   :  { %108 = vmatpush.bf16.msra.mxu0 %v99_v2  ;;  %v538_v6 = vld [vmem:[#allocation2 + $0x20] sm:$0xff]  ;;  %v537_v7 = vld [vmem:[#allocation2 + $0x18] sm:$0xff]  ;;  %v536_v8 = vld [vmem:[#allocation2 + $0x10] sm:$0xff]  ;;  %s690_s13 = smov 128   ;;  %s691_s14 = smov 8  }
  0x11   :  { %v535_v9 = vld [vmem:[#allocation2 + $0x8] sm:$0xff]  ;;  %v534_v10 = vld [vmem:[#allocation2] sm:$0xff]  ;;  %v549_v11 = vld [vmem:[#allocation5 + $0x38] sm:$0xff] }
  0x12   :  { %271 = vmatpush.bf16.msra.mxu2 %v549_v11  ;;  %v548_v12 = vld [vmem:[#allocation5 + $0x30] sm:$0xff]  ;;  %v547_v13 = vld [vmem:[#allocation5 + $0x28] sm:$0xff]  ;;  %v546_v14 = vld [vmem:[#allocation5 + $0x20] sm:$0xff] }
  0x13   :  { %436 = vmatmul.msk.bf16.vlgmr.msra.gmra.mxu0 %vm93_vm1, %v533_v3  ;;  %187 = vmatpush.bf16.msra.mxu1 %v540_v4  ;;  %v566_v16 = vld [vmem:[%s778_s2] ss:$0 sm:$0xff]  ;;  %v545_v23 = vld [vmem:[#allocation5 + $0x18] sm:$0xff]  ;;  %v544_v24 = vld [vmem:[#allocation5 + $0x10] sm:$0xff] }
  0x14   :  { %v543_v25 = vld [vmem:[#allocation5 + $0x8] sm:$0xff]  ;;  %v542_v26 = vld [vmem:[#allocation5] sm:$0xff]  ;;  %v557_v27 = vld [vmem:[#allocation7 + $0x38] sm:$0xff] }
  0x15   :  { %356 = vmatpush.bf16.msra.mxu3 %v557_v27  ;;  %v556_v28 = vld [vmem:[#allocation7 + $0x30] sm:$0xff]  ;;  %v555_v29 = vld [vmem:[#allocation7 + $0x28] sm:$0xff]  ;;  %v554_v30 = vld [vmem:[#allocation7 + $0x20] sm:$0xff] }
  0x16   :  { %272 = vmatpush.bf16.msra.mxu2 %v548_v12  ;;  %v567_v32 = vld [vmem:[%s780_s4] ss:$0 sm:$0xff]  ;;  %v553_v39 = vld [vmem:[#allocation7 + $0x18] sm:$0xff]  ;;  %v552_v40 = vld [vmem:[#allocation7 + $0x10] sm:$0xff] }
  0x17   :  { %188 = vmatpush.bf16.msra.mxu1 %v539_v5  ;;  %v551_v41 = vld [vmem:[#allocation7 + $0x8] sm:$0xff]  ;;  %v550_v42 = vld [vmem:[#allocation7] sm:$0xff]  ;;  %v371_v5 = vand.u32 127, %v370_v1 }
  0x18   :  { %v568_v44 = vld [vmem:[%s782_s6] ss:$0 sm:$0xff]  ;;  %s689_s6 = smov [#allocation8]  }
  0x19   :  { %357 = vmatpush.bf16.msra.mxu3 %v556_v28  ;;  %v569_v51 = vld [vmem:[%s784_s8] ss:$0 sm:$0xff]  ;;  %vm405_vm3 = vcmp.lt.s32.totalorder %v371_v5, 8  ;;  %vm404_vm4 = vcmp.lt.s32.totalorder %v371_v5, 4  ;;  %s416_s8 = sshll.u32 %s689_s6, 4  ;;  %s417_s8 = int_to_ptr.vmem [resolvable:$true] %s416_s8 }
  0x1a   :  { %273 = vmatpush.bf16.msra.mxu2 %v547_v13 }
  0x1b   :  { %189 = vmatpush.bf16.msra.mxu1 %v538_v6 }
  0x1d   :  { %358 = vmatpush.bf16.msra.mxu3 %v555_v29 }
  0x1e   :  { %274 = vmatpush.bf16.msra.mxu2 %v546_v14 }
  0x1f   :  { %190 = vmatpush.bf16.msra.mxu1 %v537_v7 }
  0x21   :  { %359 = vmatpush.bf16.msra.mxu3 %v554_v30 }
  0x22   :  { %275 = vmatpush.bf16.msra.mxu2 %v545_v23 }
  0x23   :  { %191 = vmatpush.bf16.msra.mxu1 %v536_v8 }
  0x25   :  { %360 = vmatpush.bf16.msra.mxu3 %v553_v39 }
  0x26   :  { %276 = vmatpush.bf16.msra.mxu2 %v544_v24 }
  0x27   :  { %192 = vmatpush.bf16.msra.mxu1 %v535_v9 }
  0x29   :  { %361 = vmatpush.bf16.msra.mxu3 %v552_v40 }
  0x2a   :  { %277 = vmatpush.bf16.msra.mxu2 %v543_v25 }
  0x2b   :  { %193 = vmatpush.bf16.msra.mxu1 %v534_v10 }
  0x2d   :  { %362 = vmatpush.bf16.msra.mxu3 %v551_v41 }
  0x2e   :  { %278 = vmatpush.bf16.msra.mxu2 %v542_v26 }
  0x31   :  { %363 = vmatpush.bf16.msra.mxu3 %v550_v42 }
  0x90   :  { %v110_v15 = vpop.f32.mrf.mxu0 }
  0x91   :  { %v111_v17 = vadd.f32 %v566_v16, %v110_v15 }
  0x93   :  { %v115_v20 = vmax.f32 %v111_v17, 0.0 }
  0x98   :  { %v112_v18 = vpop.f32.mrf.mxu0 }
  0x99   :  { %v113_v19 = vadd.f32 %v566_v16, %v112_v18 }
  0x9b   :  { %v116_v21 = vmax.f32 %v113_v19, 0.0 }
  0x9d   :  { %v117_v22 = vpack.c.bf16 %v116_v21, %v115_v20 }
  0x9f   :  { %194 = vmatmul.bf16.vlgmr.msra.gmra.mxu1 %v117_v22 }
 0x11c   :  { %v195_v31 = vpop.f32.mrf.mxu1 }
 0x11d   :  { %v196_v33 = vadd.f32 %v567_v32, %v195_v31 }
 0x11f   :  { %v200_v36 = vmax.f32 %v196_v33, 0.0 }
 0x124   :  { %v197_v34 = vpop.f32.mrf.mxu1 }
 0x125   :  { %v198_v35 = vadd.f32 %v567_v32, %v197_v34 }
 0x127   :  { %v201_v37 = vmax.f32 %v198_v35, 0.0 }
 0x129   :  { %v202_v38 = vpack.c.bf16 %v201_v37, %v200_v36 }
 0x12b   :  { %279 = vmatmul.bf16.vlgmr.msra.gmra.mxu2 %v202_v38 }
 0x1ae   :  { %v280_v43 = vpop.f32.mrf.mxu2 }
 0x1af   :  { %v281_v45 = vadd.f32 %v568_v44, %v280_v43 }
 0x1b1   :  { %v285_v48 = vmax.f32 %v281_v45, 0.0 }
 0x1b6   :  { %v282_v46 = vpop.f32.mrf.mxu2 }
 0x1b7   :  { %v283_v47 = vadd.f32 %v568_v44, %v282_v46 }
 0x1b9   :  { %v286_v49 = vmax.f32 %v283_v47, 0.0 }
 0x1bb   :  { %v287_v50 = vpack.c.bf16 %v286_v49, %v285_v48 }
 0x1bd   :  { %364 = vmatmul.bf16.vlgmr.msra.gmra.mxu3 %v287_v50 }
 0x240   :  { %v365_v52 = vpop.f32.mrf.mxu3 }
 0x241   :  { %v366_v53 = vadd.f32 %v569_v51, %v365_v52 }
 0x243   :  { %v376_v54 = vand.u32 2147483647, %v366_v53  ;;  %v374_v11 = vmax.f32 %v366_v53, 0.0 }
 0x245   :  { %v378_v55 = vsub.f32 0.0, %v376_v54 }
 0x247   :  { %v380_v56 = vmul.f32 1.442695, %v378_v55 }
 0x248   :  { %v367_v57 = vpop.f32.mrf.mxu3 }
 0x249   :  { %570 = vpow2.f32 %v380_v56  ;;  %v368_v58 = vadd.f32 %v569_v51, %v367_v57 }
 0x24b   :  { %v377_v59 = vand.u32 2147483647, %v368_v58  ;;  %v375_v22 = vmax.f32 %v368_v58, 0.0 }
 0x24d   :  { %v379_v60 = vsub.f32 0.0, %v377_v59 }
 0x24f   :  { %v571_v61 = vpop.eup %570  ;;  %v382_v62 = vmul.f32 1.442695, %v379_v60 }
 0x250   :  { %v384_v63 = vadd.f32 1.0, %v571_v61  ;;  %v387_v0 = vmul.f32 -0.5, %v571_v61  ;;  %v390_v3 = vand.u32 2147483647, %v571_v61 }
 0x251   :  { %572 = vpow2.f32 %v382_v62 }
 0x252   :  { %574 = vlog2.f32 %v384_v63  ;;  %v388_v2 = vadd.f32 1.0, %v387_v0  ;;  %vm391_vm2 = vcmp.lt.f32.partialorder %v390_v3, 0.0004427343 }
 0x253   :  { %576 = vtanh.f32 %v366_v53 }
 0x254   :  { %v389_v9 = vmul.f32 %v571_v61, %v388_v2 }
 0x257   :  { %v573_v4 = vpop.eup %572 }
 0x258   :  { %v575_v6 = vpop.eup %574  ;;  %v393_v7 = vadd.f32 1.0, %v573_v4  ;;  %v396_v10 = vmul.f32 -0.5, %v573_v4  ;;  %v399_v17 = vand.u32 2147483647, %v573_v4 }
 0x259   :  { %v386_v8 = vmul.f32 0.6931472, %v575_v6  ;;  %v577_v15 = vpop.eup %576 }
 0x25a   :  { %578 = vlog2.f32 %v393_v7  ;;  %v397_v14 = vadd.f32 1.0, %v396_v10  ;;  %vm400_vm5 = vcmp.lt.f32.partialorder %v399_v17, 0.0004427343 }
 0x25b   :  { %v392_v12 = vsel %vm391_vm2, %v389_v9, %v386_v8  ;;  %580 = vtanh.f32 %v368_v58 }
 0x25c   :  { %v402_v13 = vadd.f32 %v392_v12, %v374_v11  ;;  %v398_v21 = vmul.f32 %v573_v4, %v397_v14 }
 0x25e   :  { %v406_v16 = vsel %vm405_vm3, %v402_v13, %v366_v53 }
 0x25f   :  { %v408_v18 = vsel %vm404_vm4, %v577_v15, %v406_v16 }
 0x260   :  { %v579_v19 = vpop.eup %578  ;;  %410 = vst [vmem:[#allocation8] sm:$0xff] %v408_v18 }
 0x261   :  { %v395_v20 = vmul.f32 0.6931472, %v579_v19  ;;  %v581_v25 = vpop.eup %580 }
 0x263   :  { %v401_v23 = vsel %vm400_vm5, %v398_v21, %v395_v20 }
 0x264   :  { %v403_v24 = vadd.f32 %v401_v23, %v375_v22 }
 0x266   :  { %v407_v26 = vsel %vm405_vm3, %v403_v24, %v368_v58 }
 0x267   :  { %v409_v27 = vsel %vm404_vm4, %v581_v25, %v407_v26 }
 0x268   :  { %411 = vst [vmem:[#allocation8 + $0x8] sm:$0xff] %v409_v27 }
 0x269   :  { %424 = dma.vmem_to_hbm [thread:$0]  %s417_s8, 256, %s419_s12, [#allocation4], %s690_s13, %s690_s13, %s691_s14  }
 0x26a   :  { %682 = dma.done.wait [#allocation4], 256  }
 0x26b   :  { %683 = vsyncadd [#allocation4], 4294967040 }
 0x26c   :  { %429 = vsyncpa [#allocation3], 1 }
 0x26d   :  { %430 = vsyncpa [#allocation6], 1 }
 0x26e   :  { %431 = vsyncpa [#allocation4], 1 }

</bundles_post_ra>
